<compile_context>
chip_gen: v6e
topology: v6e:2x2x1
jax: 0.10.0
libtpu: 0.0.40
codegen_flags: <defaults>
</compile_context>

<pallas_src>
import functools

import jax
import jax.numpy as jnp
from jax.experimental import pallas as pl
from jax.experimental.pallas import tpu as pltpu


# ----------------------------------------------------------------------------
# Kernel
# ----------------------------------------------------------------------------
def _mlp_kernel(layer_dims, obs_ref, params_ref, out_ref):
    """Whole MLP in one VMEM-resident body.

    layer_dims: static tuple of (in_dim, out_dim) per linear layer.
    params_ref: packed (total_rows, max_out) slab; per layer the rows are
                [W (in_dim rows) ; b (1 row)], columns padded to max_out.
    """
    compute_dtype = params_ref.dtype  # f32 or bf16 (MXU operand dtype)
    h = obs_ref[...].astype(jnp.float32)

    row = 0
    for in_d, out_d in layer_dims:
        # Static slices of the packed slab -> free ref views, no extra DMA.
        w = params_ref[row:row + in_d, :out_d]                    # (in_d, out_d)
        b = params_ref[row + in_d:row + in_d + 1, :out_d]         # (1, out_d)
        row += in_d + 1

        acc = jnp.dot(h.astype(compute_dtype), w,
                      preferred_element_type=jnp.float32)          # MXU, f32 acc
        # Bias add + ReLU kept in f32 on the VPU (v5e has no bf16 VALU).
        h = jnp.maximum(acc + b.astype(jnp.float32), 0.0)

    out_ref[...] = h.astype(out_ref.dtype)


# ----------------------------------------------------------------------------
# Wrapper
# ----------------------------------------------------------------------------
def pack_params(weights, biases, dtype=jnp.float32):
    """Pack [W0;b0;W1;b1;...] into one 2-D slab (rows stacked, cols padded)."""
    max_out = max(w.shape[1] for w in weights)
    blocks = []
    for w, b in zip(weights, biases):
        in_d, out_d = w.shape
        wb = jnp.concatenate([w, b.reshape(1, out_d)], axis=0)     # (in_d+1, out_d)
        if out_d < max_out:
            wb = jnp.pad(wb, ((0, 0), (0, max_out - out_d)))
        blocks.append(wb)
    return jnp.concatenate(blocks, axis=0).astype(dtype)


def categorical_policy_forward(obs, packed_params, layer_dims, *, batch_tile=None):
    """Forward pass.

    obs:           (B, n_observations) float32
    packed_params: output of pack_params (f32 or bf16)
    layer_dims:    static tuple of (in_dim, out_dim) per linear layer
    batch_tile:    if set and B is a multiple with >1 tiles, use the batch-tiled
                   pipelined path (weights VMEM-resident, batch axis parallel).
    """
    B, n_obs = obs.shape
    n_actions = layer_dims[-1][1]
    kernel = functools.partial(_mlp_kernel, tuple(layer_dims))
    out_shape = jax.ShapeDtypeStruct((B, n_actions), obs.dtype)

    use_tiled = (
        batch_tile is not None
        and batch_tile % 8 == 0
        and B % batch_tile == 0
        and B // batch_tile > 1
    )

    if use_tiled:
        # Batch-tiled path: obs/out are pipelined over the grid; params use a
        # constant index_map so the single packed slab stays resident in VMEM.
        return pl.pallas_call(
            kernel,
            out_shape=out_shape,
            grid=(B // batch_tile,),
            in_specs=[
                pl.BlockSpec((batch_tile, n_obs), lambda i: (i, 0)),
                pl.BlockSpec(packed_params.shape, lambda i: (0, 0)),
            ],
            out_specs=pl.BlockSpec((batch_tile, n_actions), lambda i: (i, 0)),
            compiler_params=pltpu.CompilerParams(
                dimension_semantics=("parallel",)  # shards across v7x's 2 TCs
            ),
        )(obs, packed_params)

    # Small-batch path: no grid, no software pipeline, no double buffering —
    # both inputs land in VMEM once and the kernel runs a single step.
    return pl.pallas_call(
        kernel,
        out_shape=out_shape,
        in_specs=[
            pl.BlockSpec(memory_space=pltpu.MemorySpace.VMEM),
            pl.BlockSpec(memory_space=pltpu.MemorySpace.VMEM),
        ],
        out_specs=pl.BlockSpec(memory_space=pltpu.MemorySpace.VMEM),
    )(obs, packed_params)


# ----------------------------------------------------------------------------
# Reference / init
# ----------------------------------------------------------------------------
def _reference_forward(obs, weights, biases):
    h = obs
    for w, b in zip(weights, biases):
        h = jnp.maximum(jnp.dot(h, w) + b, 0.0)
    return h


def _init_params(key, n_observations, n_actions, n_layers, hsize):
    """Deterministic init mimicking PyTorch nn.Linear default (uniform ±1/sqrt(fan_in))."""
    dims = [n_observations] + [hsize] * (n_layers + 1) + [n_actions]
    weights, biases = [], []
    for i in range(len(dims) - 1):
        fan_in, fan_out = dims[i], dims[i + 1]
        key, kw, kb = jax.random.split(key, 3)
        bound = 1.0 / jnp.sqrt(float(fan_in))
        weights.append(jax.random.uniform(kw, (fan_in, fan_out), jnp.float32, -bound, bound))
        biases.append(jax.random.uniform(kb, (1, fan_out), jnp.float32, -bound, bound))
    return weights, biases


if __name__ == "__main__":
    # Module-consistent small shapes.
    n_observations = 16
    n_actions = 4
    n_layers = 2
    hsize = 32

    key = jax.random.PRNGKey(0)
    key, k_obs = jax.random.split(key)
    weights, biases = _init_params(key, n_observations, n_actions, n_layers, hsize)
    layer_dims = tuple((w.shape[0], w.shape[1]) for w in weights)
    packed_f32 = pack_params(weights, biases, jnp.float32)

    # --- 1) small-batch path (B=8): no grid, single VMEM-resident step -------
    obs_small = jax.random.normal(k_obs, (8, n_observations), dtype=jnp.float32)
    out_small = jax.block_until_ready(
        categorical_policy_forward(obs_small, packed_f32, layer_dims))
    ref_small = _reference_forward(obs_small, weights, biases)
    assert out_small.shape == (8, n_actions)
    assert jnp.allclose(out_small, ref_small, atol=1e-5, rtol=1e-5), "small-path mismatch"

    # --- 2) batch-tiled path (B=256, TB=128): parallel grid, resident weights
    key, k_obs2 = jax.random.split(key)
    obs_big = jax.random.normal(k_obs2, (256, n_observations), dtype=jnp.float32)
    out_big = jax.block_until_ready(
        categorical_policy_forward(obs_big, packed_f32, layer_dims, batch_tile=128))
    ref_big = _reference_forward(obs_big, weights, biases)
    assert out_big.shape == (256, n_actions)
    assert jnp.allclose(out_big, ref_big, atol=1e-5, rtol=1e-5), "tiled-path mismatch"

    # --- 3) bf16 weights (v6e/v7x MXU-friendly), f32 epilogue ----------------
    packed_bf16 = packed_f32.astype(jnp.bfloat16)
    out_bf16 = jax.block_until_ready(
        categorical_policy_forward(obs_big, packed_bf16, layer_dims, batch_tile=128))
    assert jnp.allclose(out_bf16, ref_big, atol=5e-2, rtol=5e-2), "bf16-path mismatch"

    # TODO(synk): get_action / get_lob_probs (Categorical sampling & log_prob) are
    # host-side distribution utilities over the logits, not part of the forward
    # hot path; left to plain JAX outside the kernel.

    print("KERNEL_OK")
</pallas_src>

<mosaic_0001>
module attributes {stable_mosaic.version = 11 : i64} {
  func.func @_mlp_kernel(%arg0: memref<8x16xf32, #tpu.memory_space<vmem>>, %arg1: memref<116x32xf32, #tpu.memory_space<vmem>>, %arg2: memref<8x4xf32, #tpu.memory_space<vmem>>) attributes {dimension_semantics = [], scalar_prefetch = 0 : i64, scratch_operands = 0 : i64, tpu.core_type = #tpu.core_type<tc>} {
    %c0 = arith.constant 0 : index
    %c0_0 = arith.constant 0 : index
    %0 = vector.load %arg0[%c0, %c0_0] : memref<8x16xf32, #tpu.memory_space<vmem>>, vector<8x16xf32>
    %c0_1 = arith.constant 0 : index
    %c0_2 = arith.constant 0 : index
    %1 = vector.load %arg1[%c0_1, %c0_2] : memref<116x32xf32, #tpu.memory_space<vmem>>, vector<16x32xf32>
    %c16 = arith.constant 16 : index
    %c0_3 = arith.constant 0 : index
    %2 = vector.load %arg1[%c16, %c0_3] : memref<116x32xf32, #tpu.memory_space<vmem>>, vector<1x32xf32>
    %cst = arith.constant dense<0.000000e+00> : vector<8x32xf32>
    %3 = tpu.matmul %0, %1, %cst {dimension_numbers = #tpu.dot_dimension_numbers<[1], [0], [0], [1], [0, 0, 1, 1], [], []>} : vector<8x16xf32>, vector<16x32xf32>, vector<8x32xf32> -> vector<8x32xf32>
    %4 = vector.broadcast %2 : vector<1x32xf32> to vector<8x32xf32>
    %5 = arith.addf %3, %4 : vector<8x32xf32>
    %cst_4 = arith.constant 0.000000e+00 : f32
    %6 = vector.broadcast %cst_4 : f32 to vector<8x32xf32>
    %7 = arith.maximumf %5, %6 : vector<8x32xf32>
    %c17 = arith.constant 17 : index
    %c0_5 = arith.constant 0 : index
    %8 = vector.load %arg1[%c17, %c0_5] : memref<116x32xf32, #tpu.memory_space<vmem>>, vector<32x32xf32>
    %c49 = arith.constant 49 : index
    %c0_6 = arith.constant 0 : index
    %9 = vector.load %arg1[%c49, %c0_6] : memref<116x32xf32, #tpu.memory_space<vmem>>, vector<1x32xf32>
    %cst_7 = arith.constant dense<0.000000e+00> : vector<8x32xf32>
    %10 = tpu.matmul %7, %8, %cst_7 {dimension_numbers = #tpu.dot_dimension_numbers<[1], [0], [0], [1], [0, 0, 1, 1], [], []>} : vector<8x32xf32>, vector<32x32xf32>, vector<8x32xf32> -> vector<8x32xf32>
    %11 = vector.broadcast %9 : vector<1x32xf32> to vector<8x32xf32>
    %12 = arith.addf %10, %11 : vector<8x32xf32>
    %cst_8 = arith.constant 0.000000e+00 : f32
    %13 = vector.broadcast %cst_8 : f32 to vector<8x32xf32>
    %14 = arith.maximumf %12, %13 : vector<8x32xf32>
    %c50 = arith.constant 50 : index
    %c0_9 = arith.constant 0 : index
    %15 = vector.load %arg1[%c50, %c0_9] : memref<116x32xf32, #tpu.memory_space<vmem>>, vector<32x32xf32>
    %c82 = arith.constant 82 : index
    %c0_10 = arith.constant 0 : index
    %16 = vector.load %arg1[%c82, %c0_10] : memref<116x32xf32, #tpu.memory_space<vmem>>, vector<1x32xf32>
    %cst_11 = arith.constant dense<0.000000e+00> : vector<8x32xf32>
    %17 = tpu.matmul %14, %15, %cst_11 {dimension_numbers = #tpu.dot_dimension_numbers<[1], [0], [0], [1], [0, 0, 1, 1], [], []>} : vector<8x32xf32>, vector<32x32xf32>, vector<8x32xf32> -> vector<8x32xf32>
    %18 = vector.broadcast %16 : vector<1x32xf32> to vector<8x32xf32>
    %19 = arith.addf %17, %18 : vector<8x32xf32>
    %cst_12 = arith.constant 0.000000e+00 : f32
    %20 = vector.broadcast %cst_12 : f32 to vector<8x32xf32>
    %21 = arith.maximumf %19, %20 : vector<8x32xf32>
    %c83 = arith.constant 83 : index
    %c0_13 = arith.constant 0 : index
    %22 = vector.load %arg1[%c83, %c0_13] : memref<116x32xf32, #tpu.memory_space<vmem>>, vector<32x4xf32>
    %c115 = arith.constant 115 : index
    %c0_14 = arith.constant 0 : index
    %23 = vector.load %arg1[%c115, %c0_14] : memref<116x32xf32, #tpu.memory_space<vmem>>, vector<1x4xf32>
    %cst_15 = arith.constant dense<0.000000e+00> : vector<8x4xf32>
    %24 = tpu.matmul %21, %22, %cst_15 {dimension_numbers = #tpu.dot_dimension_numbers<[1], [0], [0], [1], [0, 0, 1, 1], [], []>} : vector<8x32xf32>, vector<32x4xf32>, vector<8x4xf32> -> vector<8x4xf32>
    %25 = vector.broadcast %23 : vector<1x4xf32> to vector<8x4xf32>
    %26 = arith.addf %24, %25 : vector<8x4xf32>
    %cst_16 = arith.constant 0.000000e+00 : f32
    %27 = vector.broadcast %cst_16 : f32 to vector<8x4xf32>
    %28 = arith.maximumf %26, %27 : vector<8x4xf32>
    %c0_17 = arith.constant 0 : index
    %c0_18 = arith.constant 0 : index
    %29 = vector.load %arg2[%c0_17, %c0_18] : memref<8x4xf32, #tpu.memory_space<vmem>>, vector<8x4xf32>
    tpu.vector_store %arg2[%c0_17, %c0_18], %28 {strides = array<i32>} : memref<8x4xf32, #tpu.memory_space<vmem>>, vector<8x4xf32>,
    return
  }
}

</mosaic_0001>

<bundles_post_ra>
// kernel: tpu_custom_call.1
= control target key start
LH: loop header
LB: loop body
LE: loop exit
PB: predicated region body
PF: predicated region fallthrough
CT: control target
= control target key end

     0   :  { %v418_v0 = vmov 0.0   ;;  %vm419_vm0 = vmmov 0   ;;  %vm19_vm1 = vcmask 130048   ;;  %vm103_vm2 = vcmask 261120   ;;  %s502_s1 = inlined_call_operand.vmem [shape: f32[116,32], index: 1, kind: input, shape index: {}]   ;;  %s503_s0 = inlined_call_operand.vmem [shape: f32[8,16], index: 0, kind: input, shape index: {}]   ;;  %s504_s2 = inlined_call_operand.vmem [shape: f32[8,4], index: 2, kind: output, shape index: {}]  }
   0x1   :  { %376 = vmatprep.subr.mxu0 %v418_v0  ;;  %v13_v1 = vld [vmem:[%s502_s1 + $0x8] sm:$0xff]  ;;  %v12_v2 = vld [vmem:[%s502_s1] sm:$0xff]  ;;  %380 = vmatprep.mubr.msk.f32.mxu0 %vm419_vm0, %v418_v0  ;;  %v94_v7 = vld [vmem:[%s502_s1 + $0x11] sm:$0xff]  ;;  %vm344_vm3 = vcmask 31744  }
   0x2   :  { %377 = vmatpush3.msra.mxu0 %v13_v1  ;;  %v11_v3 = vld [vmem:[%s503_s0] sm:$0xff]  ;;  %383 = vmatprep.subr.mxu1 %v418_v0  ;;  %v97_v4 = vld [vmem:[%s502_s1 + $0x29] sm:$0xff]  ;;  %v178_v16 = vld [vmem:[%s502_s1 + $0x32] sm:$0xff] }
   0x3   :  { %378 = vmatprep.subr.mxu0 %v418_v0  ;;  %384 = vmatpush3.msra.mxu1 %v97_v4  ;;  %v96_v5 = vld [vmem:[%s502_s1 + $0x21] sm:$0xff]  ;;  %v95_v6 = vld [vmem:[%s502_s1 + $0x19] sm:$0xff]  ;;  %v181_v8 = vld [vmem:[%s502_s1 + $0x4a] sm:$0xff] }
   0x4   :  { %379 = vmatpush3.msra.mxu0 %v12_v2  ;;  %385 = vmatprep.subr.mxu1 %v418_v0  ;;  %v350_v9 = vld [vmem:[%s502_s1 + $0x10] ss:$0 sm:$0xff]  ;;  %v180_v14 = vld [vmem:[%s502_s1 + $0x42] sm:$0xff]  ;;  %v179_v15 = vld [vmem:[%s502_s1 + $0x3a] sm:$0xff] }
   0x5   :  { %381 = vmatmul.mubr.msk.f32.vlgmr.msra.gmra.mxu0 %vm19_vm1, %v11_v3  ;;  %391 = vmatprep.mubr.msk.f32.mxu1 %vm419_vm0, %v418_v0  ;;  %v264_v17 = vld [vmem:[%s502_s1 + $0x6b] sm:$0xff]  ;;  %v263_v23 = vld [vmem:[%s502_s1 + $0x63] sm:$0xff]  ;;  %v262_v24 = vld [vmem:[%s502_s1 + $0x5b] sm:$0xff] }
   0x6   :  { %394 = vmatprep.subr.mxu0 %v418_v0  ;;  %402 = vmatprep.mubr.msk.f32.mxu0 %vm419_vm0, %v418_v0  ;;  %v352_v18 = vld [vmem:[%s502_s1 + $0x31] ss:$0 sm:$0xff]  ;;  %v261_v25 = vld [vmem:[%s502_s1 + $0x53] sm:$0xff]  ;;  %v354_v26 = vld [vmem:[%s502_s1 + $0x52] ss:$0 sm:$0xff] }
   0x7   :  { %386 = vmatpush3.msra.mxu1 %v96_v5  ;;  %395 = vmatpush3.msra.mxu0 %v181_v8  ;;  %v356_v31 = vld [vmem:[%s502_s1 + $0x73] ss:$0 sm:$0xff] }
   0x8   :  { %387 = vmatprep.subr.mxu1 %v418_v0  ;;  %396 = vmatprep.subr.mxu0 %v418_v0 }
   0x9   :  { %388 = vmatpush3.msra.mxu1 %v95_v6  ;;  %397 = vmatpush3.msra.mxu0 %v180_v14 }
   0xa   :  { %389 = vmatprep.subr.mxu1 %v418_v0  ;;  %398 = vmatprep.subr.mxu0 %v418_v0 }
   0xb   :  { %390 = vmatpush3.msra.mxu1 %v94_v7  ;;  %399 = vmatpush3.msra.mxu0 %v179_v15 }
   0xc   :  { %405 = vmatprep.subr.mxu1 %v418_v0  ;;  %400 = vmatprep.subr.mxu0 %v418_v0 }
   0xd   :  { %401 = vmatpush3.msra.mxu0 %v178_v16 }
  0xc5   :  { %v89_v10 = vpop.f32.mrf.mxu0 }
  0xc6   :  { %v90_v11 = vadd.f32 %v350_v9, %v89_v10 }
  0xc7   :  { %v382_v12 = vpop.f32.mrf.mxu0 }
  0xc8   :  { %v93_v13 = vmax.f32 %v90_v11, 0.0 }
  0xca   :  { %392 = vmatmul.mubr.msk.f32.vlgmr.msra.gmra.mxu1 %vm103_vm2, %v93_v13 }
  0xcb   :  { %413 = vmatprep.mubr.msk.f32.mxu1 %vm419_vm0, %v418_v0  ;;  %406 = vmatpush3.msra.mxu1 %v264_v17 }
  0xcc   :  { %407 = vmatprep.subr.mxu1 %v418_v0 }
  0xcd   :  { %408 = vmatpush3.msra.mxu1 %v263_v23 }
  0xce   :  { %409 = vmatprep.subr.mxu1 %v418_v0 }
  0xcf   :  { %410 = vmatpush3.msra.mxu1 %v262_v24 }
  0xd0   :  { %411 = vmatprep.subr.mxu1 %v418_v0 }
  0xd1   :  { %412 = vmatpush3.msra.mxu1 %v261_v25 }
 0x18a   :  { %v173_v19 = vpop.f32.mrf.mxu1 }
 0x18b   :  { %v174_v20 = vadd.f32 %v352_v18, %v173_v19 }
 0x18c   :  { %v393_v21 = vpop.f32.mrf.mxu1 }
 0x18d   :  { %v177_v22 = vmax.f32 %v174_v20, 0.0 }
 0x18f   :  { %403 = vmatmul.mubr.msk.f32.vlgmr.msra.gmra.mxu0 %vm103_vm2, %v177_v22 }
 0x24f   :  { %v256_v27 = vpop.f32.mrf.mxu0 }
 0x250   :  { %v257_v28 = vadd.f32 %v354_v26, %v256_v27 }
 0x251   :  { %v404_v29 = vpop.f32.mrf.mxu0 }
 0x252   :  { %v260_v30 = vmax.f32 %v257_v28, 0.0 }
 0x254   :  { %414 = vmatmul.mubr.msk.f32.vlgmr.msra.gmra.mxu1 %vm103_vm2, %v260_v30 }
 0x314   :  { %v339_v32 = vpop.f32.mrf.mxu1 }
 0x315   :  { %v340_v33 = vadd.f32 %v356_v31, %v339_v32 }
 0x316   :  { %v415_v34 = vpop.f32.mrf.mxu1 }
 0x317   :  { %v343_v35 = vmax.f32 %v340_v33, 0.0 }
 0x319   :  { %345 = vst.msk [vmem:[%s504_s2] sm:$0xff] %vm344_vm3, %v343_v35 }

</bundles_post_ra>
